<compile_context>
chip_gen: v7x
topology: tpu7x:2x2x1
jax: 0.10.0
libtpu: 0.0.40
codegen_flags: <defaults>
</compile_context>

<pallas_src>
import math

import jax
import jax.numpy as jnp
from jax.experimental import pallas as pl
from jax.experimental.pallas import tpu as pltpu


def _pe_add_kernel(x_ref, pe_ref, o_ref):
    # x_ref / o_ref: (TS, M) VMEM tiles (M = batch * d_model, lane-dense).
    # pe_ref:        (1, M)  resident VMEM row; broadcast over the sublane
    #                        (seq) axis by normal jnp broadcasting.
    o_ref[...] = x_ref[...] + pe_ref[...]


def make_pe_table(d_model: int, max_len: int = 5000) -> jnp.ndarray:
    """Deterministic buffer, identical construction to the PyTorch __init__."""
    position = jnp.arange(max_len, dtype=jnp.float32)[:, None]          # [max_len, 1]
    div_term = jnp.exp(
        jnp.arange(0, d_model, 2, dtype=jnp.float32)
        * (-math.log(10000.0) / d_model)
    )                                                                    # [d_model/2]
    pe = jnp.zeros((max_len, 1, d_model), dtype=jnp.float32)
    pe = pe.at[:, 0, 0::2].set(jnp.sin(position * div_term))
    pe = pe.at[:, 0, 1::2].set(jnp.cos(position * div_term))
    return pe                                                            # [max_len, 1, d_model]


def _choose_seq_tile(S: int, row_bytes: int, target_bytes: int = 2 * 1024 * 1024) -> int:
    """Pick a seq-tile of ~target_bytes, a multiple of 8 (sublane) or full S."""
    rows = max(1, target_bytes // max(1, row_bytes))
    if rows >= S:
        return S                      # full extent: always a legal block dim
    rows = max(8, (rows // 8) * 8)    # multiple of 8 satisfies the (8,128) rule
    return min(rows, S)


def positional_encoding_forward(x: jnp.ndarray, pe: jnp.ndarray) -> jnp.ndarray:
    """x: [seq_len, batch, d_model]. Returns same shape/dtype."""
    S, B, D = x.shape
    M = B * D

    # pe[:B, 0, :] matches `self.pe[:x.size(0)]` after the PyTorch transpose
    # (indexed by batch). Flatten (B, D) -> M so the last axis is lane-dense.
    pe_row = pe[:B, 0, :].reshape(1, M).astype(x.dtype)   # [1, M]
    x2 = x.reshape(S, M)                                  # free bitcast view

    row_bytes = M * x2.dtype.itemsize
    TS = _choose_seq_tile(S, row_bytes)
    grid = (pl.cdiv(S, TS),)

    out2 = pl.pallas_call(
        _pe_add_kernel,
        out_shape=jax.ShapeDtypeStruct((S, M), x.dtype),
        grid=grid,
        in_specs=[
            pl.BlockSpec((TS, M), lambda i: (i, 0)),   # streamed seq tiles of x
            pl.BlockSpec((1, M), lambda i: (0, 0)),    # pe row resident across grid
        ],
        out_specs=pl.BlockSpec((TS, M), lambda i: (i, 0)),
        compiler_params=pltpu.CompilerParams(
            dimension_semantics=("parallel",),         # independent seq tiles
        ),
    )(x2, pe_row)

    return out2.reshape(S, B, D)


if __name__ == "__main__":
    seq_len, batch, d_model = 8, 2, 32
    max_len = 64  # small synthetic max_len (>= batch), same construction formula

    key = jax.random.PRNGKey(0)
    x = jax.random.normal(key, (seq_len, batch, d_model), dtype=jnp.float32)

    pe = make_pe_table(d_model, max_len)

    out = positional_encoding_forward(x, pe)
    out = jax.block_until_ready(out)

    # Reference check (plain JAX, identical math to the PyTorch forward).
    ref = x + pe[:batch, 0, :][None, :, :]
    assert out.shape == (seq_len, batch, d_model)
    assert jnp.allclose(out, ref, atol=1e-6), "mismatch vs reference"

    print("KERNEL_OK")
</pallas_src>

<mosaic_0001>
module attributes {stable_mosaic.version = 11 : i64} {
  func.func @_pe_add_kernel(%arg0: i32, %arg1: memref<8x64xf32, #tpu.memory_space<vmem>>, %arg2: memref<1x64xf32, #tpu.memory_space<vmem>>, %arg3: memref<8x64xf32, #tpu.memory_space<vmem>>) attributes {dimension_semantics = [#tpu.dimension_semantics<parallel>], iteration_bounds = array<i64: 1>, scalar_prefetch = 0 : i64, scratch_operands = 0 : i64, tpu.core_type = #tpu.core_type<tc>, window_params = [{transform_indices = @transform_0, window_bounds = array<i64: 8, 64>}, {pipeline_mode = #tpu.pipeline_mode<synchronous>, transform_indices = @transform_1, window_bounds = array<i64: 1, 64>}, {transform_indices = @transform_2, window_bounds = array<i64: 8, 64>}]} {
    %c0 = arith.constant 0 : index
    %c0_0 = arith.constant 0 : index
    %0 = vector.load %arg1[%c0, %c0_0] : memref<8x64xf32, #tpu.memory_space<vmem>>, vector<8x64xf32>
    %c0_1 = arith.constant 0 : index
    %c0_2 = arith.constant 0 : index
    %1 = vector.load %arg2[%c0_1, %c0_2] : memref<1x64xf32, #tpu.memory_space<vmem>>, vector<1x64xf32>
    %2 = vector.broadcast %1 : vector<1x64xf32> to vector<8x64xf32>
    %3 = arith.addf %0, %2 : vector<8x64xf32>
    %c0_3 = arith.constant 0 : index
    %c0_4 = arith.constant 0 : index
    %4 = vector.load %arg3[%c0_3, %c0_4] : memref<8x64xf32, #tpu.memory_space<vmem>>, vector<8x64xf32>
    tpu.vector_store %arg3[%c0_3, %c0_4], %3 {strides = array<i32>} : memref<8x64xf32, #tpu.memory_space<vmem>>, vector<8x64xf32>,
    return
  }
  func.func @transform_0(%arg0: i32) -> (i32, i32) {
    %c0_i32 = arith.constant 0 : i32
    %c0_i32_0 = arith.constant 0 : i32
    return %arg0, %c0_i32 : i32, i32
  }
  func.func @transform_1(%arg0: i32) -> (i32, i32) {
    %c0_i32 = arith.constant 0 : i32
    %c0_i32_0 = arith.constant 0 : i32
    %c0_i32_1 = arith.constant 0 : i32
    return %c0_i32, %c0_i32_0 : i32, i32
  }
  func.func @transform_2(%arg0: i32) -> (i32, i32) {
    %c0_i32 = arith.constant 0 : i32
    %c0_i32_0 = arith.constant 0 : i32
    return %arg0, %c0_i32 : i32, i32
  }
}

</mosaic_0001>

<bundles_post_ra>
// kernel: tpu_custom_call.1
= control target key start
LH: loop header
LB: loop body
LE: loop exit
PB: predicated region body
PF: predicated region fallthrough
CT: control target
= control target key end

     0   :  { %7 = vsyncpa [#allocation3], 0  ;;  %s145_s0 = inlined_call_operand.hbm [shape: f32[8,64], index: 0, kind: input, shape index: {}]   ;;  %s146_s1 = inlined_call_operand.vmem [shape: f32[1,64], index: 1, kind: input, shape index: {}]   ;;  %s147_s2 = inlined_call_operand.hbm [shape: f32[8,64], index: 2, kind: output, shape index: {}]  }
   0x1   :  { %8 = vsyncpa [#allocation4], 0  ;;  %s101_s9 = smov [#allocation2]   ;;  %s53_s13 = scalar_lea.hbm %s145_s0, 128 }
   0x2   :  { %s15_s10 = sshll.u32 %s101_s9, 4  ;;  %p54_p0 = scmp.ne.s32.totalorder %s145_s0, %s53_s13  ;;  %s16_s10 = int_to_ptr.vmem [resolvable:$true] %s15_s10 }
   0x3   :  { %p57_p1 = scmp.lt.u32.totalorder %s53_s13, %s145_s0 }
   0x5   :  { %p59_p2 = pnand %p57_p1, %p54_p0 }
   0x7   :  { %62 = shalt.err (!%p59_p2)
}
   0x8   :  { %s63_s18 = scalar_lea.vmem %s16_s10, 128  ;;  %p68_p4 = scmp.lt.s32.totalorder %s16_s10, %s16_s10 }
   0x9   :  { %p64_p3 = scmp.ne.s32.totalorder %s16_s10, %s63_s18  ;;  %p69_p5 = scmp.lt.s32.totalorder %s63_s18, %s63_s18 }
   0xb   :  { %p70_p6 = por %p69_p5, %p68_p4 }
   0xd   :  { %p71_p7 = pnand %p70_p6, %p64_p3 }
   0xf   :  { %74 = shalt.err (!%p71_p7)
}
  0x10   :  { %18 = dma.hbm_to_vmem [thread:$0]  %s145_s0, 128, %s16_s10, [#allocation3]  }
  0x11   :  { %97 = dma.done.wait [#allocation3], 128  }
  0x12   :  { %98 = vsyncadd [#allocation3], 4294967168  ;;  %s102_s21 = smov [#allocation5]   ;;  %v24_v0 = vld [vmem:[#allocation2] sm:$0xff]  ;;  %vm33_vm0 = vcmask 523264  }
  0x13   :  { %s41_s22 = sshll.u32 %s102_s21, 4  ;;  %v50_v1 = vld [vmem:[%s146_s1] ss:$0 sm:$0xff]  ;;  %s42_s22 = int_to_ptr.vmem [resolvable:$true] %s41_s22 }
  0x14   :  { %v32_v2 = vadd.f32 %v50_v1, %v24_v0  ;;  %s75_s25 = scalar_lea.vmem %s42_s22, 128  ;;  %p80_p9 = scmp.lt.s32.totalorder %s42_s22, %s42_s22 }
  0x15   :  { %p76_p8 = scmp.ne.s32.totalorder %s42_s22, %s75_s25  ;;  %p81_p10 = scmp.lt.s32.totalorder %s75_s25, %s75_s25 }
  0x16   :  { %34 = vst.msk [vmem:[#allocation5] sm:$0xff] %vm33_vm0, %v32_v2 }
  0x17   :  { %p82_p11 = por %p81_p10, %p80_p9 }
  0x19   :  { %p83_p12 = pnand %p82_p11, %p76_p8 }
  0x1b   :  { %86 = shalt.err (!%p83_p12)
}
  0x1c   :  { %s87_s27 = scalar_lea.hbm %s147_s2, 128 }
  0x1d   :  { %p88_p13 = scmp.ne.s32.totalorder %s147_s2, %s87_s27  ;;  %p91_p0 = scmp.lt.u32.totalorder %s87_s27, %s147_s2 }
  0x1f   :  { %p93_p1 = pnand %p91_p0, %p88_p13 }
  0x21   :  { %96 = shalt.err (!%p93_p1)
}
  0x22   :  { %44 = dma.vmem_to_hbm [thread:$0]  %s42_s22, 128, %s147_s2, [#allocation4]  }
  0x23   :  { %99 = dma.done.wait [#allocation4], 128  }
  0x24   :  { %100 = vsyncadd [#allocation4], 4294967168 }
  0x25   :  { %48 = vsyncpa [#allocation3], 1 }
  0x26   :  { %49 = vsyncpa [#allocation4], 1 }

</bundles_post_ra>
